<compile_context>
chip_gen: v7x
topology: tpu7x:2x2x1
jax: 0.10.0
libtpu: 0.0.40
codegen_flags: <defaults>
</compile_context>

<pallas_src>
import functools
import math

import jax
import jax.numpy as jnp
from jax.experimental import pallas as pl
from jax.experimental.pallas import tpu as pltpu

# ----------------------------------------------------------------------------
# Lanczos lgamma (g=5, n=7, Numerical-Recipes coefficients) as one rational
# P(zz)/Q(zz):  lgamma(zz+1) = HALF_LOG_2PI + (zz+0.5)*log(zz+5.5) - (zz+5.5)
#                              + log(P(zz)/Q(zz))
# ----------------------------------------------------------------------------
_LANCZOS_G = 5.0
_G_PLUS_HALF = _LANCZOS_G + 0.5          # 5.5
_LANCZOS_COEFS = (
    1.000000000190015,
    76.18009172947146,
    -86.50532032941677,
    24.01409824083091,
    -1.231739572450155,
    0.1208650973866179e-2,
    -0.5395239384953e-5,
)
_HALF_LOG_2PI = 0.5 * math.log(2.0 * math.pi)
_N_TERMS = len(_LANCZOS_COEFS) - 1       # 6 partial fractions


def _poly_mul(a, b):
    out = [0.0] * (len(a) + len(b) - 1)
    for i, ai in enumerate(a):
        for j, bj in enumerate(b):
            out[i + j] += ai * bj
    return out


def _lanczos_rational_coeffs():
    # s(z) = c0 + sum_{i=1..6} ci/(z+i)  ==  P(z)/Q(z)
    # Q(z) = prod_{k=1..6}(z+k); P(z) = c0*Q(z) + sum_i ci*prod_{k!=i}(z+k).
    # Ascending coefficients (z^0 first), computed in double precision once.
    q = [1.0]
    for k in range(1, _N_TERMS + 1):
        q = _poly_mul(q, [float(k), 1.0])
    p = [_LANCZOS_COEFS[0] * c for c in q]
    for i in range(1, _N_TERMS + 1):
        term = [1.0]
        for k in range(1, _N_TERMS + 1):
            if k != i:
                term = _poly_mul(term, [float(k), 1.0])
        ci = _LANCZOS_COEFS[i]
        for d, td in enumerate(term):
            p[d] += ci * td
    return tuple(p), tuple(q)


_LANCZOS_P, _LANCZOS_Q = _lanczos_rational_coeffs()     # degree-6 each


def _horner(z, coeffs):
    acc = coeffs[-1]
    for c in reversed(coeffs[:-1]):
        acc = acc * z + c
    return acc


# ----------------------------------------------------------------------------
# Kernel.
# ----------------------------------------------------------------------------
_CHUNK_G = 128   # lane-group chunk width inside the tile body


def _zinb_kernel(x_ref, mean_ref, disp_ref, pi_ref, sf_ref, out_ref, acc_ref,
                 *, ridge_lambda):
    j = pl.program_id(1)  # reduction (gene-tile) axis, last in the grid

    @pl.when(j == 0)
    def _():
        acc_ref[...] = jnp.zeros_like(acc_ref)

    eps = jnp.float32(1e-10)
    tn, tg = x_ref.shape

    # Hoisted once per grid step (JAX does not CSE broadcast_in_dim).
    sf_b = jnp.broadcast_to(sf_ref[...].astype(jnp.float32), (tn, _CHUNK_G))

    # Static loop over 128-lane column chunks: the full (tn, tg) result is
    # never materialized -- each chunk is folded straight into the accumulator.
    for k in range(tg // _CHUNK_G):
        cols = slice(k * _CHUNK_G, (k + 1) * _CHUNK_G)
        x = x_ref[:, cols].astype(jnp.float32)
        mu = mean_ref[:, cols].astype(jnp.float32) * sf_b
        th = disp_ref[:, cols].astype(jnp.float32)
        p = pi_ref[:, cols].astype(jnp.float32)

        # Shared logs, computed once and reused.
        l_th = jnp.log(th + eps)          # log(disp + eps)
        l_tm = jnp.log(th + mu + eps)     # log(disp + mean + eps)
        l_mu = jnp.log(mu + eps)          # log(mean + eps)

        # ---- fused  lgamma(disp+eps) + lgamma(x+1) - lgamma(x+disp+eps) ----
        a = th + eps
        small_a = a < 0.5                 # lgamma(a) = lgamma(a+1) - log(a)
        zz_a = jnp.where(small_a, a, a - 1.0)
        zz_b = x                          # lgamma(x+1): argument >= 1 always
        zz_c = (x + a) - 1.0              # lgamma(x+disp+eps); NB branch only
                                          # selected for x >= 1 (count data)
        t_a = zz_a + _G_PLUS_HALF
        t_b = zz_b + _G_PLUS_HALF
        t_c = zz_c + _G_PLUS_HALF

        pa = _horner(zz_a, _LANCZOS_P)
        qa = _horner(zz_a, _LANCZOS_Q)
        pb = _horner(zz_b, _LANCZOS_P)
        qb = _horner(zz_b, _LANCZOS_Q)
        pc = _horner(zz_c, _LANCZOS_P)
        qc = _horner(zz_c, _LANCZOS_Q)

        # log(A_a) + log(A_b) - log(A_c) collapsed to ONE log; ratios grouped
        # so every factor stays O(1) (no f32 overflow for counts up to ~2.6e6).
        rat = (pa / qa) * (pb / pc) * (qc / qb)

        t1 = (_HALF_LOG_2PI
              + (zz_a + 0.5) * jnp.log(t_a) - t_a
              + (zz_b + 0.5) * jnp.log(t_b) - t_b
              - ((zz_c + 0.5) * jnp.log(t_c) - t_c)
              + jnp.log(rat)
              - jnp.where(small_a, l_th, 0.0))   # reuse l_th == log(disp+eps)

        # log(1 + mean/(disp+eps)) == l_tm - l_th  (no divide)
        t2 = (th + x) * (l_tm - l_th) + x * (l_th - l_mu)
        nb_case = t1 + t2 - jnp.log(1.0 - p + eps)

        # (disp/(disp+mean+eps))^disp == exp(disp*(l_th - l_tm)); well defined
        # at disp == 0 (gives 1, matching torch.pow(0, 0) == 1).
        zero_nb = jnp.exp(th * (l_th - l_tm))
        zero_case = -jnp.log(p + (1.0 - p) * zero_nb + eps)

        res = jnp.where(x <= 1e-8, zero_case, nb_case)
        if ridge_lambda > 0.0:
            res = res + jnp.float32(ridge_lambda) * (p * p)

        acc_ref[...] += res

    # Emit a lane-dense (8, 128) partial only on the last reduction step.
    @pl.when(j == pl.num_programs(1) - 1)
    def _():
        red = acc_ref[...]
        part = red[0:8, :]
        for kk in range(1, tn // 8):
            part = part + red[kk * 8:(kk + 1) * 8, :]
        out_ref[...] = part


# ----------------------------------------------------------------------------
# Tile pickers.
# ----------------------------------------------------------------------------
def _pick_tile_n(n, pref):
    t = min(pref, n)
    t = max(8, t - (t % 8))
    while n % t:
        t -= 8
    # Prefer an even number of N tiles: grid axis 0 is "parallel" and shards
    # across v7x's 2 TensorCores.  Shrink the tile at most 2x to achieve it.
    if (n // t) % 2 == 1:
        h = t // 2
        if h >= 8 and h % 8 == 0 and n % h == 0:
            t = h
    return t


def _pick_tile_g(g, pref):
    t = min(pref, g)
    t = max(128, t - (t % 128))
    while g % t:
        t -= 128
    return t


# ----------------------------------------------------------------------------
# Wrapper.
# ----------------------------------------------------------------------------
def zinb_loss(x, mean, disp, pi, scale_factor, ridge_lambda=0.0, *,
              tile_n=256, tile_g=2048):
    """ZINB loss (scalar), matching PyTorch ZINBLoss.forward."""
    n, g = x.shape
    assert n % 8 == 0, "N must be a multiple of 8"
    assert g % 128 == 0, "G must be a multiple of 128"
    tile_n = _pick_tile_n(n, tile_n)
    tile_g = _pick_tile_g(g, tile_g)
    n_tiles = n // tile_n
    g_tiles = g // tile_g

    sf = jnp.asarray(scale_factor, jnp.float32).reshape(n, 1)

    kernel = functools.partial(_zinb_kernel, ridge_lambda=float(ridge_lambda))

    dense_spec = pl.BlockSpec((tile_n, tile_g), lambda i, j: (i, j))

    # Advisory cost so XLA can schedule the surrounding graph around the call.
    bytes_in = sum(int(a.size) * a.dtype.itemsize for a in (x, mean, disp, pi))
    cost = pl.CostEstimate(
        flops=int(115 * n * g),
        transcendentals=int(13 * n * g),
        bytes_accessed=int(bytes_in + sf.size * 4 + n_tiles * 8 * 128 * 4),
    )

    # VMEM budget at the (256, 2048) defaults: 4 inputs x 2 buffers x 2 MiB
    # = 16 MiB + (tile_n,128) accumulator; limit set explicitly and kept well
    # under v7x's 64 MiB physical VMEM (v5e/v6e have 128 MiB).
    partials = pl.pallas_call(
        kernel,
        out_shape=jax.ShapeDtypeStruct((n_tiles * 8, 128), jnp.float32),
        grid_spec=pltpu.PrefetchScalarGridSpec(
            num_scalar_prefetch=0,
            grid=(n_tiles, g_tiles),
            in_specs=[
                dense_spec,                                      # x
                dense_spec,                                      # mean
                dense_spec,                                      # disp
                dense_spec,                                      # pi
                pl.BlockSpec((tile_n, 1), lambda i, j: (i, 0)),  # scale_factor
            ],
            out_specs=pl.BlockSpec((8, 128), lambda i, j: (i, 0)),
            scratch_shapes=[pltpu.VMEM((tile_n, 128), jnp.float32)],
        ),
        compiler_params=pltpu.CompilerParams(
            dimension_semantics=("parallel", "arbitrary"),
            vmem_limit_bytes=40 * 1024 * 1024),
        cost_estimate=cost,
    )(x, mean, disp, pi, sf)   # original dtypes passed through; kernel casts

    return jnp.sum(partials) / jnp.float32(n * g)


if __name__ == "__main__":
    key = jax.random.PRNGKey(0)
    k1, k2, k3, k4, k5 = jax.random.split(key, 5)

    N, G = 8, 256  # small, (8,128)-aligned

    # count-like data (some exact zeros so both branches of the where() hit)
    x = jnp.floor(jax.random.uniform(k1, (N, G), minval=0.0, maxval=5.0))
    mean = jax.random.uniform(k2, (N, G), minval=0.5, maxval=3.0)
    disp = jax.random.uniform(k3, (N, G), minval=0.5, maxval=2.0)
    pi = jax.random.uniform(k4, (N, G), minval=0.05, maxval=0.9)
    scale_factor = jax.random.uniform(k5, (N,), minval=0.5, maxval=1.5)

    loss = zinb_loss(x, mean, disp, pi, scale_factor, ridge_lambda=0.1)
    jax.block_until_ready(loss)

    # pure-JAX reference (same math as the PyTorch module, jax lgamma)
    eps = 1e-10
    sf = scale_factor[:, None]
    m = mean * sf
    t1 = (jax.lax.lgamma(disp + eps) + jax.lax.lgamma(x + 1.0)
          - jax.lax.lgamma(x + disp + eps))
    t2 = (disp + x) * jnp.log(1.0 + m / (disp + eps)) \
        + x * (jnp.log(disp + eps) - jnp.log(m + eps))
    nb_case = t1 + t2 - jnp.log(1.0 - pi + eps)
    zero_nb = jnp.power(disp / (disp + m + eps), disp)
    zero_case = -jnp.log(pi + (1.0 - pi) * zero_nb + eps)
    ref = jnp.where(x <= 1e-8, zero_case, nb_case) + 0.1 * jnp.square(pi)
    ref = jnp.mean(ref)

    assert jnp.allclose(loss, ref, rtol=1e-4, atol=1e-4), (loss, ref)
    print("KERNEL_OK")
</pallas_src>

<mosaic_0001>
module attributes {stable_mosaic.version = 11 : i64} {
  func.func @_zinb_kernel(%arg0: i32, %arg1: i32, %arg2: memref<8x256xf32, #tpu.memory_space<vmem>>, %arg3: memref<8x256xf32, #tpu.memory_space<vmem>>, %arg4: memref<8x256xf32, #tpu.memory_space<vmem>>, %arg5: memref<8x256xf32, #tpu.memory_space<vmem>>, %arg6: memref<8x1xf32, #tpu.memory_space<vmem>>, %arg7: memref<8x128xf32, #tpu.memory_space<vmem>>, %arg8: memref<8x128xf32, #tpu.memory_space<vmem>>) attributes {dimension_semantics = [#tpu.dimension_semantics<parallel>, #tpu.dimension_semantics<arbitrary>], iteration_bounds = array<i64: 1, 1>, scalar_prefetch = 0 : i64, scratch_operands = 1 : i64, tpu.core_type = #tpu.core_type<tc>, window_params = [{transform_indices = @transform_0, window_bounds = array<i64: 8, 256>}, {transform_indices = @transform_1, window_bounds = array<i64: 8, 256>}, {transform_indices = @transform_2, window_bounds = array<i64: 8, 256>}, {transform_indices = @transform_3, window_bounds = array<i64: 8, 256>}, {transform_indices = @transform_4, window_bounds = array<i64: 8, 1>}, {transform_indices = @transform_5, window_bounds = array<i64: 8, 128>}]} {
    %c0_i32 = arith.constant 0 : i32
    %0 = arith.cmpi eq, %arg1, %c0_i32 : i32
    %1 = arith.extui %0 : i1 to i32
    %c0_i32_0 = arith.constant 0 : i32
    %2 = arith.cmpi ne, %1, %c0_i32_0 : i32
    scf.if %2 {
      %cst_154 = arith.constant 0.000000e+00 : f32
      %427 = vector.broadcast %cst_154 : f32 to vector<8x128xf32>
      %c0_155 = arith.constant 0 : index
      %c0_156 = arith.constant 0 : index
      %428 = vector.load %arg8[%c0_155, %c0_156] : memref<8x128xf32, #tpu.memory_space<vmem>>, vector<8x128xf32>
      tpu.vector_store %arg8[%c0_155, %c0_156], %427 {strides = array<i32>} : memref<8x128xf32, #tpu.memory_space<vmem>>, vector<8x128xf32>,
    } else {
    }
    %c0 = arith.constant 0 : index
    %c0_1 = arith.constant 0 : index
    %3 = vector.load %arg6[%c0, %c0_1] : memref<8x1xf32, #tpu.memory_space<vmem>>, vector<8x1xf32>
    %4 = vector.shape_cast %3 : vector<8x1xf32> to vector<8x1xf32>
    %5 = vector.broadcast %4 : vector<8x1xf32> to vector<8x128xf32>
    %c0_2 = arith.constant 0 : index
    %c0_3 = arith.constant 0 : index
    %6 = vector.load %arg2[%c0_2, %c0_3] : memref<8x256xf32, #tpu.memory_space<vmem>>, vector<8x128xf32>
    %c0_4 = arith.constant 0 : index
    %c0_5 = arith.constant 0 : index
    %7 = vector.load %arg3[%c0_4, %c0_5] : memref<8x256xf32, #tpu.memory_space<vmem>>, vector<8x128xf32>
    %8 = arith.mulf %7, %5 : vector<8x128xf32>
    %c0_6 = arith.constant 0 : index
    %c0_7 = arith.constant 0 : index
    %9 = vector.load %arg4[%c0_6, %c0_7] : memref<8x256xf32, #tpu.memory_space<vmem>>, vector<8x128xf32>
    %c0_8 = arith.constant 0 : index
    %c0_9 = arith.constant 0 : index
    %10 = vector.load %arg5[%c0_8, %c0_9] : memref<8x256xf32, #tpu.memory_space<vmem>>, vector<8x128xf32>
    %cst = arith.constant 1.000000e-10 : f32
    %11 = vector.broadcast %cst : f32 to vector<8x128xf32>
    %12 = arith.addf %9, %11 : vector<8x128xf32>
    %13 = math.log %12 : vector<8x128xf32>
    %14 = arith.addf %9, %8 : vector<8x128xf32>
    %cst_10 = arith.constant 1.000000e-10 : f32
    %15 = vector.broadcast %cst_10 : f32 to vector<8x128xf32>
    %16 = arith.addf %14, %15 : vector<8x128xf32>
    %17 = math.log %16 : vector<8x128xf32>
    %cst_11 = arith.constant 1.000000e-10 : f32
    %18 = vector.broadcast %cst_11 : f32 to vector<8x128xf32>
    %19 = arith.addf %8, %18 : vector<8x128xf32>
    %20 = math.log %19 : vector<8x128xf32>
    %cst_12 = arith.constant 1.000000e-10 : f32
    %21 = vector.broadcast %cst_12 : f32 to vector<8x128xf32>
    %22 = arith.addf %9, %21 : vector<8x128xf32>
    %cst_13 = arith.constant 5.000000e-01 : f32
    %23 = vector.broadcast %cst_13 : f32 to vector<8x128xf32>
    %24 = arith.cmpf olt, %22, %23 : vector<8x128xf32>
    %cst_14 = arith.constant 1.000000e+00 : f32
    %25 = vector.broadcast %cst_14 : f32 to vector<8x128xf32>
    %26 = arith.subf %22, %25 : vector<8x128xf32>
    %27 = arith.select %24, %22, %26 : vector<8x128xi1>, vector<8x128xf32>
    %28 = arith.addf %6, %22 : vector<8x128xf32>
    %cst_15 = arith.constant 1.000000e+00 : f32
    %29 = vector.broadcast %cst_15 : f32 to vector<8x128xf32>
    %30 = arith.subf %28, %29 : vector<8x128xf32>
    %cst_16 = arith.constant 5.500000e+00 : f32
    %31 = vector.broadcast %cst_16 : f32 to vector<8x128xf32>
    %32 = arith.addf %27, %31 : vector<8x128xf32>
    %cst_17 = arith.constant 5.500000e+00 : f32
    %33 = vector.broadcast %cst_17 : f32 to vector<8x128xf32>
    %34 = arith.addf %6, %33 : vector<8x128xf32>
    %cst_18 = arith.constant 5.500000e+00 : f32
    %35 = vector.broadcast %cst_18 : f32 to vector<8x128xf32>
    %36 = arith.addf %30, %35 : vector<8x128xf32>
    %cst_19 = arith.constant 1.000000e+00 : f32
    %37 = vector.broadcast %cst_19 : f32 to vector<8x128xf32>
    %38 = arith.mulf %37, %27 : vector<8x128xf32>
    %cst_20 = arith.constant 33.4583321 : f32
    %39 = vector.broadcast %cst_20 : f32 to vector<8x128xf32>
    %40 = arith.addf %38, %39 : vector<8x128xf32>
    %41 = arith.mulf %40, %27 : vector<8x128xf32>
    %cst_21 = arith.constant 466.334198 : f32
    %42 = vector.broadcast %cst_21 : f32 to vector<8x128xf32>
    %43 = arith.addf %41, %42 : vector<8x128xf32>
    %44 = arith.mulf %43, %27 : vector<8x128xf32>
    %cst_22 = arith.constant 3465.70947 : f32
    %45 = vector.broadcast %cst_22 : f32 to vector<8x128xf32>
    %46 = arith.addf %44, %45 : vector<8x128xf32>
    %47 = arith.mulf %46, %27 : vector<8x128xf32>
    %cst_23 = arith.constant 14484.9141 : f32
    %48 = vector.broadcast %cst_23 : f32 to vector<8x128xf32>
    %49 = arith.addf %47, %48 : vector<8x128xf32>
    %50 = arith.mulf %49, %27 : vector<8x128xf32>
    %cst_24 = arith.constant 32281.0645 : f32
    %51 = vector.broadcast %cst_24 : f32 to vector<8x128xf32>
    %52 = arith.addf %50, %51 : vector<8x128xf32>
    %53 = arith.mulf %52, %27 : vector<8x128xf32>
    %cst_25 = arith.constant 29969.5938 : f32
    %54 = vector.broadcast %cst_25 : f32 to vector<8x128xf32>
    %55 = arith.addf %53, %54 : vector<8x128xf32>
    %cst_26 = arith.constant 1.000000e+00 : f32
    %56 = vector.broadcast %cst_26 : f32 to vector<8x128xf32>
    %57 = arith.mulf %56, %27 : vector<8x128xf32>
    %cst_27 = arith.constant 2.100000e+01 : f32
    %58 = vector.broadcast %cst_27 : f32 to vector<8x128xf32>
    %59 = arith.addf %57, %58 : vector<8x128xf32>
    %60 = arith.mulf %59, %27 : vector<8x128xf32>
    %cst_28 = arith.constant 1.750000e+02 : f32
    %61 = vector.broadcast %cst_28 : f32 to vector<8x128xf32>
    %62 = arith.addf %60, %61 : vector<8x128xf32>
    %63 = arith.mulf %62, %27 : vector<8x128xf32>
    %cst_29 = arith.constant 7.350000e+02 : f32
    %64 = vector.broadcast %cst_29 : f32 to vector<8x128xf32>
    %65 = arith.addf %63, %64 : vector<8x128xf32>
    %66 = arith.mulf %65, %27 : vector<8x128xf32>
    %cst_30 = arith.constant 1.624000e+03 : f32
    %67 = vector.broadcast %cst_30 : f32 to vector<8x128xf32>
    %68 = arith.addf %66, %67 : vector<8x128xf32>
    %69 = arith.mulf %68, %27 : vector<8x128xf32>
    %cst_31 = arith.constant 1.764000e+03 : f32
    %70 = vector.broadcast %cst_31 : f32 to vector<8x128xf32>
    %71 = arith.addf %69, %70 : vector<8x128xf32>
    %72 = arith.mulf %71, %27 : vector<8x128xf32>
    %cst_32 = arith.constant 7.200000e+02 : f32
    %73 = vector.broadcast %cst_32 : f32 to vector<8x128xf32>
    %74 = arith.addf %72, %73 : vector<8x128xf32>
    %cst_33 = arith.constant 1.000000e+00 : f32
    %75 = vector.broadcast %cst_33 : f32 to vector<8x128xf32>
    %76 = arith.mulf %75, %6 : vector<8x128xf32>
    %cst_34 = arith.constant 33.4583321 : f32
    %77 = vector.broadcast %cst_34 : f32 to vector<8x128xf32>
    %78 = arith.addf %76, %77 : vector<8x128xf32>
    %79 = arith.mulf %78, %6 : vector<8x128xf32>
    %cst_35 = arith.constant 466.334198 : f32
    %80 = vector.broadcast %cst_35 : f32 to vector<8x128xf32>
    %81 = arith.addf %79, %80 : vector<8x128xf32>
    %82 = arith.mulf %81, %6 : vector<8x128xf32>
    %cst_36 = arith.constant 3465.70947 : f32
    %83 = vector.broadcast %cst_36 : f32 to vector<8x128xf32>
    %84 = arith.addf %82, %83 : vector<8x128xf32>
    %85 = arith.mulf %84, %6 : vector<8x128xf32>
    %cst_37 = arith.constant 14484.9141 : f32
    %86 = vector.broadcast %cst_37 : f32 to vector<8x128xf32>
    %87 = arith.addf %85, %86 : vector<8x128xf32>
    %88 = arith.mulf %87, %6 : vector<8x128xf32>
    %cst_38 = arith.constant 32281.0645 : f32
    %89 = vector.broadcast %cst_38 : f32 to vector<8x128xf32>
    %90 = arith.addf %88, %89 : vector<8x128xf32>
    %91 = arith.mulf %90, %6 : vector<8x128xf32>
    %cst_39 = arith.constant 29969.5938 : f32
    %92 = vector.broadcast %cst_39 : f32 to vector<8x128xf32>
    %93 = arith.addf %91, %92 : vector<8x128xf32>
    %cst_40 = arith.constant 1.000000e+00 : f32
    %94 = vector.broadcast %cst_40 : f32 to vector<8x128xf32>
    %95 = arith.mulf %94, %6 : vector<8x128xf32>
    %cst_41 = arith.constant 2.100000e+01 : f32
    %96 = vector.broadcast %cst_41 : f32 to vector<8x128xf32>
    %97 = arith.addf %95, %96 : vector<8x128xf32>
    %98 = arith.mulf %97, %6 : vector<8x128xf32>
    %cst_42 = arith.constant 1.750000e+02 : f32
    %99 = vector.broadcast %cst_42 : f32 to vector<8x128xf32>
    %100 = arith.addf %98, %99 : vector<8x128xf32>
    %101 = arith.mulf %100, %6 : vector<8x128xf32>
    %cst_43 = arith.constant 7.350000e+02 : f32
    %102 = vector.broadcast %cst_43 : f32 to vector<8x128xf32>
    %103 = arith.addf %101, %102 : vector<8x128xf32>
    %104 = arith.mulf %103, %6 : vector<8x128xf32>
    %cst_44 = arith.constant 1.624000e+03 : f32
    %105 = vector.broadcast %cst_44 : f32 to vector<8x128xf32>
    %106 = arith.addf %104, %105 : vector<8x128xf32>
    %107 = arith.mulf %106, %6 : vector<8x128xf32>
    %cst_45 = arith.constant 1.764000e+03 : f32
    %108 = vector.broadcast %cst_45 : f32 to vector<8x128xf32>
    %109 = arith.addf %107, %108 : vector<8x128xf32>
    %110 = arith.mulf %109, %6 : vector<8x128xf32>
    %cst_46 = arith.constant 7.200000e+02 : f32
    %111 = vector.broadcast %cst_46 : f32 to vector<8x128xf32>
    %112 = arith.addf %110, %111 : vector<8x128xf32>
    %cst_47 = arith.constant 1.000000e+00 : f32
    %113 = vector.broadcast %cst_47 : f32 to vector<8x128xf32>
    %114 = arith.mulf %113, %30 : vector<8x128xf32>
    %cst_48 = arith.constant 33.4583321 : f32
    %115 = vector.broadcast %cst_48 : f32 to vector<8x128xf32>
    %116 = arith.addf %114, %115 : vector<8x128xf32>
    %117 = arith.mulf %116, %30 : vector<8x128xf32>
    %cst_49 = arith.constant 466.334198 : f32
    %118 = vector.broadcast %cst_49 : f32 to vector<8x128xf32>
    %119 = arith.addf %117, %118 : vector<8x128xf32>
    %120 = arith.mulf %119, %30 : vector<8x128xf32>
    %cst_50 = arith.constant 3465.70947 : f32
    %121 = vector.broadcast %cst_50 : f32 to vector<8x128xf32>
    %122 = arith.addf %120, %121 : vector<8x128xf32>
    %123 = arith.mulf %122, %30 : vector<8x128xf32>
    %cst_51 = arith.constant 14484.9141 : f32
    %124 = vector.broadcast %cst_51 : f32 to vector<8x128xf32>
    %125 = arith.addf %123, %124 : vector<8x128xf32>
    %126 = arith.mulf %125, %30 : vector<8x128xf32>
    %cst_52 = arith.constant 32281.0645 : f32
    %127 = vector.broadcast %cst_52 : f32 to vector<8x128xf32>
    %128 = arith.addf %126, %127 : vector<8x128xf32>
    %129 = arith.mulf %128, %30 : vector<8x128xf32>
    %cst_53 = arith.constant 29969.5938 : f32
    %130 = vector.broadcast %cst_53 : f32 to vector<8x128xf32>
    %131 = arith.addf %129, %130 : vector<8x128xf32>
    %cst_54 = arith.constant 1.000000e+00 : f32
    %132 = vector.broadcast %cst_54 : f32 to vector<8x128xf32>
    %133 = arith.mulf %132, %30 : vector<8x128xf32>
    %cst_55 = arith.constant 2.100000e+01 : f32
    %134 = vector.broadcast %cst_55 : f32 to vector<8x128xf32>
    %135 = arith.addf %133, %134 : vector<8x128xf32>
    %136 = arith.mulf %135, %30 : vector<8x128xf32>
    %cst_56 = arith.constant 1.750000e+02 : f32
    %137 = vector.broadcast %cst_56 : f32 to vector<8x128xf32>
    %138 = arith.addf %136, %137 : vector<8x128xf32>
    %139 = arith.mulf %138, %30 : vector<8x128xf32>
    %cst_57 = arith.constant 7.350000e+02 : f32
    %140 = vector.broadcast %cst_57 : f32 to vector<8x128xf32>
    %141 = arith.addf %139, %140 : vector<8x128xf32>
    %142 = arith.mulf %141, %30 : vector<8x128xf32>
    %cst_58 = arith.constant 1.624000e+03 : f32
    %143 = vector.broadcast %cst_58 : f32 to vector<8x128xf32>
    %144 = arith.addf %142, %143 : vector<8x128xf32>
    %145 = arith.mulf %144, %30 : vector<8x128xf32>
    %cst_59 = arith.constant 1.764000e+03 : f32
    %146 = vector.broadcast %cst_59 : f32 to vector<8x128xf32>
    %147 = arith.addf %145, %146 : vector<8x128xf32>
    %148 = arith.mulf %147, %30 : vector<8x128xf32>
    %cst_60 = arith.constant 7.200000e+02 : f32
    %149 = vector.broadcast %cst_60 : f32 to vector<8x128xf32>
    %150 = arith.addf %148, %149 : vector<8x128xf32>
    %151 = arith.divf %55, %74 : vector<8x128xf32>
    %152 = arith.divf %93, %131 : vector<8x128xf32>
    %153 = arith.mulf %151, %152 : vector<8x128xf32>
    %154 = arith.divf %150, %112 : vector<8x128xf32>
    %155 = arith.mulf %153, %154 : vector<8x128xf32>
    %cst_61 = arith.constant 5.000000e-01 : f32
    %156 = vector.broadcast %cst_61 : f32 to vector<8x128xf32>
    %157 = arith.addf %27, %156 : vector<8x128xf32>
    %158 = math.log %32 : vector<8x128xf32>
    %159 = arith.mulf %157, %158 : vector<8x128xf32>
    %cst_62 = arith.constant 0.918938517 : f32
    %160 = vector.broadcast %cst_62 : f32 to vector<8x128xf32>
    %161 = arith.addf %160, %159 : vector<8x128xf32>
    %162 = arith.subf %161, %32 : vector<8x128xf32>
    %cst_63 = arith.constant 5.000000e-01 : f32
    %163 = vector.broadcast %cst_63 : f32 to vector<8x128xf32>
    %164 = arith.addf %6, %163 : vector<8x128xf32>
    %165 = math.log %34 : vector<8x128xf32>
    %166 = arith.mulf %164, %165 : vector<8x128xf32>
    %167 = arith.addf %162, %166 : vector<8x128xf32>
    %168 = arith.subf %167, %34 : vector<8x128xf32>
    %cst_64 = arith.constant 5.000000e-01 : f32
    %169 = vector.broadcast %cst_64 : f32 to vector<8x128xf32>
    %170 = arith.addf %30, %169 : vector<8x128xf32>
    %171 = math.log %36 : vector<8x128xf32>
    %172 = arith.mulf %170, %171 : vector<8x128xf32>
    %173 = arith.subf %172, %36 : vector<8x128xf32>
    %174 = arith.subf %168, %173 : vector<8x128xf32>
    %175 = math.log %155 : vector<8x128xf32>
    %176 = arith.addf %174, %175 : vector<8x128xf32>
    %cst_65 = arith.constant 0.000000e+00 : f32
    %177 = vector.broadcast %cst_65 : f32 to vector<8x128xf32>
    %178 = arith.select %24, %13, %177 : vector<8x128xi1>, vector<8x128xf32>
    %179 = arith.subf %176, %178 : vector<8x128xf32>
    %180 = arith.addf %9, %6 : vector<8x128xf32>
    %181 = arith.subf %17, %13 : vector<8x128xf32>
    %182 = arith.mulf %180, %181 : vector<8x128xf32>
    %183 = arith.subf %13, %20 : vector<8x128xf32>
    %184 = arith.mulf %6, %183 : vector<8x128xf32>
    %185 = arith.addf %182, %184 : vector<8x128xf32>
    %186 = arith.addf %179, %185 : vector<8x128xf32>
    %cst_66 = arith.constant 1.000000e+00 : f32
    %187 = vector.broadcast %cst_66 : f32 to vector<8x128xf32>
    %188 = arith.subf %187, %10 : vector<8x128xf32>
    %cst_67 = arith.constant 1.000000e-10 : f32
    %189 = vector.broadcast %cst_67 : f32 to vector<8x128xf32>
    %190 = arith.addf %188, %189 : vector<8x128xf32>
    %191 = math.log %190 : vector<8x128xf32>
    %192 = arith.subf %186, %191 : vector<8x128xf32>
    %193 = arith.subf %13, %17 : vector<8x128xf32>
    %194 = arith.mulf %9, %193 : vector<8x128xf32>
    %195 = math.exp %194 : vector<8x128xf32>
    %cst_68 = arith.constant 1.000000e+00 : f32
    %196 = vector.broadcast %cst_68 : f32 to vector<8x128xf32>
    %197 = arith.subf %196, %10 : vector<8x128xf32>
    %198 = arith.mulf %197, %195 : vector<8x128xf32>
    %199 = arith.addf %10, %198 : vector<8x128xf32>
    %cst_69 = arith.constant 1.000000e-10 : f32
    %200 = vector.broadcast %cst_69 : f32 to vector<8x128xf32>
    %201 = arith.addf %199, %200 : vector<8x128xf32>
    %202 = math.log %201 : vector<8x128xf32>
    %cst_70 = arith.constant 0.000000e+00 : f32
    %203 = vector.broadcast %cst_70 : f32 to vector<8x128xf32>
    %204 = arith.subf %203, %202 : vector<8x128xf32>
    %cst_71 = arith.constant 9.99999993E-9 : f32
    %205 = vector.broadcast %cst_71 : f32 to vector<8x128xf32>
    %206 = arith.cmpf ole, %6, %205 : vector<8x128xf32>
    %207 = arith.select %206, %204, %192 : vector<8x128xi1>, vector<8x128xf32>
    %208 = arith.mulf %10, %10 : vector<8x128xf32>
    %cst_72 = arith.constant 1.000000e-01 : f32
    %209 = vector.broadcast %cst_72 : f32 to vector<8x128xf32>
    %210 = arith.mulf %209, %208 : vector<8x128xf32>
    %211 = arith.addf %207, %210 : vector<8x128xf32>
    %c0_73 = arith.constant 0 : index
    %c0_74 = arith.constant 0 : index
    %212 = vector.load %arg8[%c0_73, %c0_74] : memref<8x128xf32, #tpu.memory_space<vmem>>, vector<8x128xf32>
    %213 = arith.addf %212, %211 : vector<8x128xf32>
    %c0_75 = arith.constant 0 : index
    %c0_76 = arith.constant 0 : index
    %214 = vector.load %arg8[%c0_75, %c0_76] : memref<8x128xf32, #tpu.memory_space<vmem>>, vector<8x128xf32>
    tpu.vector_store %arg8[%c0_75, %c0_76], %213 {strides = array<i32>} : memref<8x128xf32, #tpu.memory_space<vmem>>, vector<8x128xf32>,
    %c0_77 = arith.constant 0 : index
    %c128 = arith.constant 128 : index
    %215 = vector.load %arg2[%c0_77, %c128] : memref<8x256xf32, #tpu.memory_space<vmem>>, vector<8x128xf32>
    %c0_78 = arith.constant 0 : index
    %c128_79 = arith.constant 128 : index
    %216 = vector.load %arg3[%c0_78, %c128_79] : memref<8x256xf32, #tpu.memory_space<vmem>>, vector<8x128xf32>
    %217 = arith.mulf %216, %5 : vector<8x128xf32>
    %c0_80 = arith.constant 0 : index
    %c128_81 = arith.constant 128 : index
    %218 = vector.load %arg4[%c0_80, %c128_81] : memref<8x256xf32, #tpu.memory_space<vmem>>, vector<8x128xf32>
    %c0_82 = arith.constant 0 : index
    %c128_83 = arith.constant 128 : index
    %219 = vector.load %arg5[%c0_82, %c128_83] : memref<8x256xf32, #tpu.memory_space<vmem>>, vector<8x128xf32>
    %cst_84 = arith.constant 1.000000e-10 : f32
    %220 = vector.broadcast %cst_84 : f32 to vector<8x128xf32>
    %221 = arith.addf %218, %220 : vector<8x128xf32>
    %222 = math.log %221 : vector<8x128xf32>
    %223 = arith.addf %218, %217 : vector<8x128xf32>
    %cst_85 = arith.constant 1.000000e-10 : f32
    %224 = vector.broadcast %cst_85 : f32 to vector<8x128xf32>
    %225 = arith.addf %223, %224 : vector<8x128xf32>
    %226 = math.log %225 : vector<8x128xf32>
    %cst_86 = arith.constant 1.000000e-10 : f32
    %227 = vector.broadcast %cst_86 : f32 to vector<8x128xf32>
    %228 = arith.addf %217, %227 : vector<8x128xf32>
    %229 = math.log %228 : vector<8x128xf32>
    %cst_87 = arith.constant 1.000000e-10 : f32
    %230 = vector.broadcast %cst_87 : f32 to vector<8x128xf32>
    %231 = arith.addf %218, %230 : vector<8x128xf32>
    %cst_88 = arith.constant 5.000000e-01 : f32
    %232 = vector.broadcast %cst_88 : f32 to vector<8x128xf32>
    %233 = arith.cmpf olt, %231, %232 : vector<8x128xf32>
    %cst_89 = arith.constant 1.000000e+00 : f32
    %234 = vector.broadcast %cst_89 : f32 to vector<8x128xf32>
    %235 = arith.subf %231, %234 : vector<8x128xf32>
    %236 = arith.select %233, %231, %235 : vector<8x128xi1>, vector<8x128xf32>
    %237 = arith.addf %215, %231 : vector<8x128xf32>
    %cst_90 = arith.constant 1.000000e+00 : f32
    %238 = vector.broadcast %cst_90 : f32 to vector<8x128xf32>
    %239 = arith.subf %237, %238 : vector<8x128xf32>
    %cst_91 = arith.constant 5.500000e+00 : f32
    %240 = vector.broadcast %cst_91 : f32 to vector<8x128xf32>
    %241 = arith.addf %236, %240 : vector<8x128xf32>
    %cst_92 = arith.constant 5.500000e+00 : f32
    %242 = vector.broadcast %cst_92 : f32 to vector<8x128xf32>
    %243 = arith.addf %215, %242 : vector<8x128xf32>
    %cst_93 = arith.constant 5.500000e+00 : f32
    %244 = vector.broadcast %cst_93 : f32 to vector<8x128xf32>
    %245 = arith.addf %239, %244 : vector<8x128xf32>
    %cst_94 = arith.constant 1.000000e+00 : f32
    %246 = vector.broadcast %cst_94 : f32 to vector<8x128xf32>
    %247 = arith.mulf %246, %236 : vector<8x128xf32>
    %cst_95 = arith.constant 33.4583321 : f32
    %248 = vector.broadcast %cst_95 : f32 to vector<8x128xf32>
    %249 = arith.addf %247, %248 : vector<8x128xf32>
    %250 = arith.mulf %249, %236 : vector<8x128xf32>
    %cst_96 = arith.constant 466.334198 : f32
    %251 = vector.broadcast %cst_96 : f32 to vector<8x128xf32>
    %252 = arith.addf %250, %251 : vector<8x128xf32>
    %253 = arith.mulf %252, %236 : vector<8x128xf32>
    %cst_97 = arith.constant 3465.70947 : f32
    %254 = vector.broadcast %cst_97 : f32 to vector<8x128xf32>
    %255 = arith.addf %253, %254 : vector<8x128xf32>
    %256 = arith.mulf %255, %236 : vector<8x128xf32>
    %cst_98 = arith.constant 14484.9141 : f32
    %257 = vector.broadcast %cst_98 : f32 to vector<8x128xf32>
    %258 = arith.addf %256, %257 : vector<8x128xf32>
    %259 = arith.mulf %258, %236 : vector<8x128xf32>
    %cst_99 = arith.constant 32281.0645 : f32
    %260 = vector.broadcast %cst_99 : f32 to vector<8x128xf32>
    %261 = arith.addf %259, %260 : vector<8x128xf32>
    %262 = arith.mulf %261, %236 : vector<8x128xf32>
    %cst_100 = arith.constant 29969.5938 : f32
    %263 = vector.broadcast %cst_100 : f32 to vector<8x128xf32>
    %264 = arith.addf %262, %263 : vector<8x128xf32>
    %cst_101 = arith.constant 1.000000e+00 : f32
    %265 = vector.broadcast %cst_101 : f32 to vector<8x128xf32>
    %266 = arith.mulf %265, %236 : vector<8x128xf32>
    %cst_102 = arith.constant 2.100000e+01 : f32
    %267 = vector.broadcast %cst_102 : f32 to vector<8x128xf32>
    %268 = arith.addf %266, %267 : vector<8x128xf32>
    %269 = arith.mulf %268, %236 : vector<8x128xf32>
    %cst_103 = arith.constant 1.750000e+02 : f32
    %270 = vector.broadcast %cst_103 : f32 to vector<8x128xf32>
    %271 = arith.addf %269, %270 : vector<8x128xf32>
    %272 = arith.mulf %271, %236 : vector<8x128xf32>
    %cst_104 = arith.constant 7.350000e+02 : f32
    %273 = vector.broadcast %cst_104 : f32 to vector<8x128xf32>
    %274 = arith.addf %272, %273 : vector<8x128xf32>
    %275 = arith.mulf %274, %236 : vector<8x128xf32>
    %cst_105 = arith.constant 1.624000e+03 : f32
    %276 = vector.broadcast %cst_105 : f32 to vector<8x128xf32>
    %277 = arith.addf %275, %276 : vector<8x128xf32>
    %278 = arith.mulf %277, %236 : vector<8x128xf32>
    %cst_106 = arith.constant 1.764000e+03 : f32
    %279 = vector.broadcast %cst_106 : f32 to vector<8x128xf32>
    %280 = arith.addf %278, %279 : vector<8x128xf32>
    %281 = arith.mulf %280, %236 : vector<8x128xf32>
    %cst_107 = arith.constant 7.200000e+02 : f32
    %282 = vector.broadcast %cst_107 : f32 to vector<8x128xf32>
    %283 = arith.addf %281, %282 : vector<8x128xf32>
    %cst_108 = arith.constant 1.000000e+00 : f32
    %284 = vector.broadcast %cst_108 : f32 to vector<8x128xf32>
    %285 = arith.mulf %284, %215 : vector<8x128xf32>
    %cst_109 = arith.constant 33.4583321 : f32
    %286 = vector.broadcast %cst_109 : f32 to vector<8x128xf32>
    %287 = arith.addf %285, %286 : vector<8x128xf32>
    %288 = arith.mulf %287, %215 : vector<8x128xf32>
    %cst_110 = arith.constant 466.334198 : f32
    %289 = vector.broadcast %cst_110 : f32 to vector<8x128xf32>
    %290 = arith.addf %288, %289 : vector<8x128xf32>
    %291 = arith.mulf %290, %215 : vector<8x128xf32>
    %cst_111 = arith.constant 3465.70947 : f32
    %292 = vector.broadcast %cst_111 : f32 to vector<8x128xf32>
    %293 = arith.addf %291, %292 : vector<8x128xf32>
    %294 = arith.mulf %293, %215 : vector<8x128xf32>
    %cst_112 = arith.constant 14484.9141 : f32
    %295 = vector.broadcast %cst_112 : f32 to vector<8x128xf32>
    %296 = arith.addf %294, %295 : vector<8x128xf32>
    %297 = arith.mulf %296, %215 : vector<8x128xf32>
    %cst_113 = arith.constant 32281.0645 : f32
    %298 = vector.broadcast %cst_113 : f32 to vector<8x128xf32>
    %299 = arith.addf %297, %298 : vector<8x128xf32>
    %300 = arith.mulf %299, %215 : vector<8x128xf32>
    %cst_114 = arith.constant 29969.5938 : f32
    %301 = vector.broadcast %cst_114 : f32 to vector<8x128xf32>
    %302 = arith.addf %300, %301 : vector<8x128xf32>
    %cst_115 = arith.constant 1.000000e+00 : f32
    %303 = vector.broadcast %cst_115 : f32 to vector<8x128xf32>
    %304 = arith.mulf %303, %215 : vector<8x128xf32>
    %cst_116 = arith.constant 2.100000e+01 : f32
    %305 = vector.broadcast %cst_116 : f32 to vector<8x128xf32>
    %306 = arith.addf %304, %305 : vector<8x128xf32>
    %307 = arith.mulf %306, %215 : vector<8x128xf32>
    %cst_117 = arith.constant 1.750000e+02 : f32
    %308 = vector.broadcast %cst_117 : f32 to vector<8x128xf32>
    %309 = arith.addf %307, %308 : vector<8x128xf32>
    %310 = arith.mulf %309, %215 : vector<8x128xf32>
    %cst_118 = arith.constant 7.350000e+02 : f32
    %311 = vector.broadcast %cst_118 : f32 to vector<8x128xf32>
    %312 = arith.addf %310, %311 : vector<8x128xf32>
    %313 = arith.mulf %312, %215 : vector<8x128xf32>
    %cst_119 = arith.constant 1.624000e+03 : f32
    %314 = vector.broadcast %cst_119 : f32 to vector<8x128xf32>
    %315 = arith.addf %313, %314 : vector<8x128xf32>
    %316 = arith.mulf %315, %215 : vector<8x128xf32>
    %cst_120 = arith.constant 1.764000e+03 : f32
    %317 = vector.broadcast %cst_120 : f32 to vector<8x128xf32>
    %318 = arith.addf %316, %317 : vector<8x128xf32>
    %319 = arith.mulf %318, %215 : vector<8x128xf32>
    %cst_121 = arith.constant 7.200000e+02 : f32
    %320 = vector.broadcast %cst_121 : f32 to vector<8x128xf32>
    %321 = arith.addf %319, %320 : vector<8x128xf32>
    %cst_122 = arith.constant 1.000000e+00 : f32
    %322 = vector.broadcast %cst_122 : f32 to vector<8x128xf32>
    %323 = arith.mulf %322, %239 : vector<8x128xf32>
    %cst_123 = arith.constant 33.4583321 : f32
    %324 = vector.broadcast %cst_123 : f32 to vector<8x128xf32>
    %325 = arith.addf %323, %324 : vector<8x128xf32>
    %326 = arith.mulf %325, %239 : vector<8x128xf32>
    %cst_124 = arith.constant 466.334198 : f32
    %327 = vector.broadcast %cst_124 : f32 to vector<8x128xf32>
    %328 = arith.addf %326, %327 : vector<8x128xf32>
    %329 = arith.mulf %328, %239 : vector<8x128xf32>
    %cst_125 = arith.constant 3465.70947 : f32
    %330 = vector.broadcast %cst_125 : f32 to vector<8x128xf32>
    %331 = arith.addf %329, %330 : vector<8x128xf32>
    %332 = arith.mulf %331, %239 : vector<8x128xf32>
    %cst_126 = arith.constant 14484.9141 : f32
    %333 = vector.broadcast %cst_126 : f32 to vector<8x128xf32>
    %334 = arith.addf %332, %333 : vector<8x128xf32>
    %335 = arith.mulf %334, %239 : vector<8x128xf32>
    %cst_127 = arith.constant 32281.0645 : f32
    %336 = vector.broadcast %cst_127 : f32 to vector<8x128xf32>
    %337 = arith.addf %335, %336 : vector<8x128xf32>
    %338 = arith.mulf %337, %239 : vector<8x128xf32>
    %cst_128 = arith.constant 29969.5938 : f32
    %339 = vector.broadcast %cst_128 : f32 to vector<8x128xf32>
    %340 = arith.addf %338, %339 : vector<8x128xf32>
    %cst_129 = arith.constant 1.000000e+00 : f32
    %341 = vector.broadcast %cst_129 : f32 to vector<8x128xf32>
    %342 = arith.mulf %341, %239 : vector<8x128xf32>
    %cst_130 = arith.constant 2.100000e+01 : f32
    %343 = vector.broadcast %cst_130 : f32 to vector<8x128xf32>
    %344 = arith.addf %342, %343 : vector<8x128xf32>
    %345 = arith.mulf %344, %239 : vector<8x128xf32>
    %cst_131 = arith.constant 1.750000e+02 : f32
    %346 = vector.broadcast %cst_131 : f32 to vector<8x128xf32>
    %347 = arith.addf %345, %346 : vector<8x128xf32>
    %348 = arith.mulf %347, %239 : vector<8x128xf32>
    %cst_132 = arith.constant 7.350000e+02 : f32
    %349 = vector.broadcast %cst_132 : f32 to vector<8x128xf32>
    %350 = arith.addf %348, %349 : vector<8x128xf32>
    %351 = arith.mulf %350, %239 : vector<8x128xf32>
    %cst_133 = arith.constant 1.624000e+03 : f32
    %352 = vector.broadcast %cst_133 : f32 to vector<8x128xf32>
    %353 = arith.addf %351, %352 : vector<8x128xf32>
    %354 = arith.mulf %353, %239 : vector<8x128xf32>
    %cst_134 = arith.constant 1.764000e+03 : f32
    %355 = vector.broadcast %cst_134 : f32 to vector<8x128xf32>
    %356 = arith.addf %354, %355 : vector<8x128xf32>
    %357 = arith.mulf %356, %239 : vector<8x128xf32>
    %cst_135 = arith.constant 7.200000e+02 : f32
    %358 = vector.broadcast %cst_135 : f32 to vector<8x128xf32>
    %359 = arith.addf %357, %358 : vector<8x128xf32>
    %360 = arith.divf %264, %283 : vector<8x128xf32>
    %361 = arith.divf %302, %340 : vector<8x128xf32>
    %362 = arith.mulf %360, %361 : vector<8x128xf32>
    %363 = arith.divf %359, %321 : vector<8x128xf32>
    %364 = arith.mulf %362, %363 : vector<8x128xf32>
    %cst_136 = arith.constant 5.000000e-01 : f32
    %365 = vector.broadcast %cst_136 : f32 to vector<8x128xf32>
    %366 = arith.addf %236, %365 : vector<8x128xf32>
    %367 = math.log %241 : vector<8x128xf32>
    %368 = arith.mulf %366, %367 : vector<8x128xf32>
    %cst_137 = arith.constant 0.918938517 : f32
    %369 = vector.broadcast %cst_137 : f32 to vector<8x128xf32>
    %370 = arith.addf %369, %368 : vector<8x128xf32>
    %371 = arith.subf %370, %241 : vector<8x128xf32>
    %cst_138 = arith.constant 5.000000e-01 : f32
    %372 = vector.broadcast %cst_138 : f32 to vector<8x128xf32>
    %373 = arith.addf %215, %372 : vector<8x128xf32>
    %374 = math.log %243 : vector<8x128xf32>
    %375 = arith.mulf %373, %374 : vector<8x128xf32>
    %376 = arith.addf %371, %375 : vector<8x128xf32>
    %377 = arith.subf %376, %243 : vector<8x128xf32>
    %cst_139 = arith.constant 5.000000e-01 : f32
    %378 = vector.broadcast %cst_139 : f32 to vector<8x128xf32>
    %379 = arith.addf %239, %378 : vector<8x128xf32>
    %380 = math.log %245 : vector<8x128xf32>
    %381 = arith.mulf %379, %380 : vector<8x128xf32>
    %382 = arith.subf %381, %245 : vector<8x128xf32>
    %383 = arith.subf %377, %382 : vector<8x128xf32>
    %384 = math.log %364 : vector<8x128xf32>
    %385 = arith.addf %383, %384 : vector<8x128xf32>
    %cst_140 = arith.constant 0.000000e+00 : f32
    %386 = vector.broadcast %cst_140 : f32 to vector<8x128xf32>
    %387 = arith.select %233, %222, %386 : vector<8x128xi1>, vector<8x128xf32>
    %388 = arith.subf %385, %387 : vector<8x128xf32>
    %389 = arith.addf %218, %215 : vector<8x128xf32>
    %390 = arith.subf %226, %222 : vector<8x128xf32>
    %391 = arith.mulf %389, %390 : vector<8x128xf32>
    %392 = arith.subf %222, %229 : vector<8x128xf32>
    %393 = arith.mulf %215, %392 : vector<8x128xf32>
    %394 = arith.addf %391, %393 : vector<8x128xf32>
    %395 = arith.addf %388, %394 : vector<8x128xf32>
    %cst_141 = arith.constant 1.000000e+00 : f32
    %396 = vector.broadcast %cst_141 : f32 to vector<8x128xf32>
    %397 = arith.subf %396, %219 : vector<8x128xf32>
    %cst_142 = arith.constant 1.000000e-10 : f32
    %398 = vector.broadcast %cst_142 : f32 to vector<8x128xf32>
    %399 = arith.addf %397, %398 : vector<8x128xf32>
    %400 = math.log %399 : vector<8x128xf32>
    %401 = arith.subf %395, %400 : vector<8x128xf32>
    %402 = arith.subf %222, %226 : vector<8x128xf32>
    %403 = arith.mulf %218, %402 : vector<8x128xf32>
    %404 = math.exp %403 : vector<8x128xf32>
    %cst_143 = arith.constant 1.000000e+00 : f32
    %405 = vector.broadcast %cst_143 : f32 to vector<8x128xf32>
    %406 = arith.subf %405, %219 : vector<8x128xf32>
    %407 = arith.mulf %406, %404 : vector<8x128xf32>
    %408 = arith.addf %219, %407 : vector<8x128xf32>
    %cst_144 = arith.constant 1.000000e-10 : f32
    %409 = vector.broadcast %cst_144 : f32 to vector<8x128xf32>
    %410 = arith.addf %408, %409 : vector<8x128xf32>
    %411 = math.log %410 : vector<8x128xf32>
    %cst_145 = arith.constant 0.000000e+00 : f32
    %412 = vector.broadcast %cst_145 : f32 to vector<8x128xf32>
    %413 = arith.subf %412, %411 : vector<8x128xf32>
    %cst_146 = arith.constant 9.99999993E-9 : f32
    %414 = vector.broadcast %cst_146 : f32 to vector<8x128xf32>
    %415 = arith.cmpf ole, %215, %414 : vector<8x128xf32>
    %416 = arith.select %415, %413, %401 : vector<8x128xi1>, vector<8x128xf32>
    %417 = arith.mulf %219, %219 : vector<8x128xf32>
    %cst_147 = arith.constant 1.000000e-01 : f32
    %418 = vector.broadcast %cst_147 : f32 to vector<8x128xf32>
    %419 = arith.mulf %418, %417 : vector<8x128xf32>
    %420 = arith.addf %416, %419 : vector<8x128xf32>
    %c0_148 = arith.constant 0 : index
    %c0_149 = arith.constant 0 : index
    %421 = vector.load %arg8[%c0_148, %c0_149] : memref<8x128xf32, #tpu.memory_space<vmem>>, vector<8x128xf32>
    %422 = arith.addf %421, %420 : vector<8x128xf32>
    %c0_150 = arith.constant 0 : index
    %c0_151 = arith.constant 0 : index
    %423 = vector.load %arg8[%c0_150, %c0_151] : memref<8x128xf32, #tpu.memory_space<vmem>>, vector<8x128xf32>
    tpu.vector_store %arg8[%c0_150, %c0_151], %422 {strides = array<i32>} : memref<8x128xf32, #tpu.memory_space<vmem>>, vector<8x128xf32>,
    %c0_i32_152 = arith.constant 0 : i32
    %424 = arith.cmpi eq, %arg1, %c0_i32_152 : i32
    %425 = arith.extui %424 : i1 to i32
    %c0_i32_153 = arith.constant 0 : i32
    %426 = arith.cmpi ne, %425, %c0_i32_153 : i32
    scf.if %426 {
      %c0_154 = arith.constant 0 : index
      %c0_155 = arith.constant 0 : index
      %427 = vector.load %arg8[%c0_154, %c0_155] : memref<8x128xf32, #tpu.memory_space<vmem>>, vector<8x128xf32>
      %c0_156 = arith.constant 0 : index
      %c0_157 = arith.constant 0 : index
      %428 = vector.load %arg7[%c0_156, %c0_157] : memref<8x128xf32, #tpu.memory_space<vmem>>, vector<8x128xf32>
      tpu.vector_store %arg7[%c0_156, %c0_157], %427 {strides = array<i32>} : memref<8x128xf32, #tpu.memory_space<vmem>>, vector<8x128xf32>,
    } else {
    }
    return
  }
  func.func @transform_0(%arg0: i32, %arg1: i32) -> (i32, i32) {
    %c0_i32 = arith.constant 0 : i32
    return %arg0, %arg1 : i32, i32
  }
  func.func @transform_1(%arg0: i32, %arg1: i32) -> (i32, i32) {
    %c0_i32 = arith.constant 0 : i32
    return %arg0, %arg1 : i32, i32
  }
  func.func @transform_2(%arg0: i32, %arg1: i32) -> (i32, i32) {
    %c0_i32 = arith.constant 0 : i32
    return %arg0, %arg1 : i32, i32
  }
  func.func @transform_3(%arg0: i32, %arg1: i32) -> (i32, i32) {
    %c0_i32 = arith.constant 0 : i32
    return %arg0, %arg1 : i32, i32
  }
  func.func @transform_4(%arg0: i32, %arg1: i32) -> (i32, i32) {
    %c0_i32 = arith.constant 0 : i32
    %c0_i32_0 = arith.constant 0 : i32
    return %arg0, %c0_i32 : i32, i32
  }
  func.func @transform_5(%arg0: i32, %arg1: i32) -> (i32, i32) {
    %c0_i32 = arith.constant 0 : i32
    %c0_i32_0 = arith.constant 0 : i32
    return %arg0, %c0_i32 : i32, i32
  }
}

</mosaic_0001>

<bundles_post_ra>
// kernel: tpu_custom_call.1
= control target key start
LH: loop header
LB: loop body
LE: loop exit
PB: predicated region body
PF: predicated region fallthrough
CT: control target
= control target key end

     0   :  { %10 = vsyncpa [#allocation4], 0  ;;  %s871_s0 = inlined_call_operand.hbm [shape: f32[8,256], index: 0, kind: input, shape index: {}]   ;;  %s872_s1 = inlined_call_operand.hbm [shape: f32[8,256], index: 1, kind: input, shape index: {}]   ;;  %s873_s2 = inlined_call_operand.hbm [shape: f32[8,256], index: 2, kind: input, shape index: {}]   ;;  %s874_s3 = inlined_call_operand.hbm [shape: f32[8,256], index: 3, kind: input, shape index: {}]   ;;  %s875_s4 = inlined_call_operand.vmem [shape: f32[8,1], index: 4, kind: input, shape index: {}]   ;;  %s876_s5 = inlined_call_operand.hbm [shape: f32[8,128], index: 5, kind: output, shape index: {}]  }
   0x1   :  { %11 = vsyncpa [#allocation7], 0 }
   0x2   :  { %12 = vsyncpa [#allocation10], 0 }
   0x3   :  { %13 = vsyncpa [#allocation5], 0  ;;  %s582_s18 = smov [#allocation6]   ;;  %s583_s20 = smov [#allocation3]  }
   0x4   :  { %s30_s19 = sshll.u32 %s582_s18, 4  ;;  %s20_s21 = sshll.u32 %s583_s20, 4  ;;  %s31_s19 = int_to_ptr.vmem [resolvable:$true] %s30_s19  ;;  %s21_s21 = int_to_ptr.vmem [resolvable:$true] %s20_s21 }
   0x5   :  { %s464_s24 = scalar_lea.hbm %s872_s1, 256 }
   0x6   :  { %p465_p0 = scmp.ne.s32.totalorder %s872_s1, %s464_s24  ;;  %p468_p1 = scmp.lt.u32.totalorder %s464_s24, %s872_s1 }
   0x8   :  { %p470_p2 = pnand %p468_p1, %p465_p0 }
   0xa   :  { %473 = shalt.err (!%p470_p2)
}
   0xb   :  { %s474_s29 = scalar_lea.vmem %s31_s19, 256  ;;  %p479_p4 = scmp.lt.s32.totalorder %s31_s19, %s31_s19 }
   0xc   :  { %p475_p3 = scmp.ne.s32.totalorder %s31_s19, %s474_s29  ;;  %p480_p5 = scmp.lt.s32.totalorder %s474_s29, %s474_s29 }
   0xe   :  { %p481_p6 = por %p480_p5, %p479_p4 }
  0x10   :  { %p482_p7 = pnand %p481_p6, %p475_p3 }
  0x12   :  { %485 = shalt.err (!%p482_p7)
}
  0x13   :  { %33 = dma.hbm_to_vmem [thread:$0]  %s872_s1, 256, %s31_s19, [#allocation7]  }
  0x14   :  { %s486_s9 = scalar_lea.hbm %s871_s0, 256 }
  0x15   :  { %p487_p8 = scmp.ne.s32.totalorder %s871_s0, %s486_s9  ;;  %p490_p9 = scmp.lt.u32.totalorder %s486_s9, %s871_s0 }
  0x17   :  { %p492_p10 = pnand %p490_p9, %p487_p8 }
  0x19   :  { %495 = shalt.err (!%p492_p10)
}
  0x1a   :  { %s496_s14 = scalar_lea.vmem %s21_s21, 256  ;;  %p501_p12 = scmp.lt.s32.totalorder %s21_s21, %s21_s21 }
  0x1b   :  { %p497_p11 = scmp.ne.s32.totalorder %s21_s21, %s496_s14  ;;  %p502_p13 = scmp.lt.s32.totalorder %s496_s14, %s496_s14 }
  0x1d   :  { %p503_p0 = por %p502_p13, %p501_p12 }
  0x1f   :  { %p504_p1 = pnand %p503_p0, %p497_p11 }
  0x21   :  { %507 = shalt.err (!%p504_p1)
}
  0x22   :  { %23 = dma.hbm_to_vmem [thread:$0]  %s871_s0, 256, %s21_s21, [#allocation4]  }
  0x23   :  { %s584_s16 = smov [#allocation8]   ;;  %s585_s18 = smov [#allocation9]  }
  0x24   :  { %s40_s17 = sshll.u32 %s584_s16, 4  ;;  %s50_s19 = sshll.u32 %s585_s18, 4  ;;  %s41_s17 = int_to_ptr.vmem [resolvable:$true] %s40_s17  ;;  %s51_s19 = int_to_ptr.vmem [resolvable:$true] %s50_s19 }
  0x25   :  { %s508_s23 = scalar_lea.hbm %s873_s2, 256 }
  0x26   :  { %p509_p2 = scmp.ne.s32.totalorder %s873_s2, %s508_s23  ;;  %p512_p3 = scmp.lt.u32.totalorder %s508_s23, %s873_s2 }
  0x28   :  { %p514_p4 = pnand %p512_p3, %p509_p2 }
  0x2a   :  { %517 = shalt.err (!%p514_p4)
}
  0x2b   :  { %s518_s0 = scalar_lea.vmem %s41_s17, 256  ;;  %p523_p6 = scmp.lt.s32.totalorder %s41_s17, %s41_s17 }
  0x2c   :  { %p519_p5 = scmp.ne.s32.totalorder %s41_s17, %s518_s0  ;;  %p524_p7 = scmp.lt.s32.totalorder %s518_s0, %s518_s0 }
  0x2e   :  { %p525_p8 = por %p524_p7, %p523_p6 }
  0x30   :  { %p526_p9 = pnand %p525_p8, %p519_p5 }
  0x32   :  { %529 = shalt.err (!%p526_p9)
}
  0x33   :  { %43 = dma.hbm_to_vmem [thread:$0]  %s873_s2, 256, %s41_s17, [#allocation7]  }
  0x34   :  { %s530_s6 = scalar_lea.hbm %s874_s3, 256 }
  0x35   :  { %p531_p10 = scmp.ne.s32.totalorder %s874_s3, %s530_s6  ;;  %p534_p11 = scmp.lt.u32.totalorder %s530_s6, %s874_s3 }
  0x37   :  { %p536_p12 = pnand %p534_p11, %p531_p10 }
  0x39   :  { %539 = shalt.err (!%p536_p12)
}
  0x3a   :  { %s540_s11 = scalar_lea.vmem %s51_s19, 256  ;;  %p545_p0 = scmp.lt.s32.totalorder %s51_s19, %s51_s19 }
  0x3b   :  { %p541_p13 = scmp.ne.s32.totalorder %s51_s19, %s540_s11  ;;  %p546_p1 = scmp.lt.s32.totalorder %s540_s11, %s540_s11 }
  0x3d   :  { %p547_p2 = por %p546_p1, %p545_p0 }
  0x3f   :  { %p548_p3 = pnand %p547_p2, %p541_p13 }
  0x41   :  { %551 = shalt.err (!%p548_p3)
}
  0x42   :  { %53 = dma.hbm_to_vmem [thread:$0]  %s874_s3, 256, %s51_s19, [#allocation10]  }
  0x43   :  { %574 = dma.done.wait [#allocation4], 256  }
  0x44   :  { %575 = vsyncadd [#allocation4], 4294967040 }
  0x45   :  { %576 = dma.done.wait [#allocation7], 512  }
  0x46   :  { %577 = vsyncadd [#allocation7], 4294966784 }
  0x47   :  { %578 = dma.done.wait [#allocation10], 256  }
  0x48   :  { %579 = vsyncadd [#allocation10], 4294967040  ;;  %v586_v0 = vmov 0   ;;  %v73_v1 = vld [vmem:[%s875_s4] sm:$0xff]  ;;  %v676_v5 = vld [vmem:[#allocation8 + $0x8] sm:$0xff]  ;;  %s587_s3 = smov [#allocation11]  }
  0x49   :  { %411 = vset.pattern.permute.xlu0 %v586_v0  ;;  %v669_v2 = vld [vmem:[#allocation8] sm:$0xff]  ;;  %v682_v8 = vadd.f32 1e-10, %v676_v5  ;;  %v685_v9 = vld [vmem:[#allocation3 + $0x8] sm:$0xff]  ;;  %s390_s4 = sshll.u32 %s587_s3, 4  ;;  %s391_s4 = int_to_ptr.vmem [resolvable:$true] %s390_s4 }
  0x4a   :  { %76 = vperm.xlu0 %411, %v73_v1   ;;  %v672_v3 = vadd.f32 1e-10, %v669_v2  ;;  %v674_v4 = vld [vmem:[#allocation3] sm:$0xff]  ;;  %v285_v27 = vadd.f32 21.0, %v685_v9  ;;  %v274_v47 = vadd.f32 33.458332, %v685_v9  ;;  %p557_p5 = scmp.lt.s32.totalorder %s391_s4, %s391_s4 }
  0x4b   :  { %v403_v12 = vadd.f32 -1.0, %v682_v8  ;;  %v247_v13 = vadd.f32 %v682_v8, %v685_v9  ;;  %vm244_vm1 = vcmp.lt.f32.partialorder %v682_v8, 0.5  ;;  %v135_v19 = vadd.f32 21.0, %v674_v4  ;;  %s552_s1 = scalar_lea.vmem %s391_s4, 128 }
  0x4c   :  { %v401_v6 = vadd.f32 -1.0, %v672_v3  ;;  %v97_v7 = vadd.f32 %v672_v3, %v674_v4  ;;  %vm94_vm0 = vcmp.lt.f32.partialorder %v672_v3, 0.5  ;;  %v124_v30 = vadd.f32 33.458332, %v674_v4  ;;  %p553_p4 = scmp.ne.s32.totalorder %s391_s4, %s552_s1  ;;  %p558_p6 = scmp.lt.s32.totalorder %s552_s1, %s552_s1 }
  0x4d   :  { %v700_v16 = vadd.f32 -1.0, %v247_v13  ;;  %v705_v17 = vsel %vm244_vm1, %v682_v8, %v403_v12  ;;  %v136_v24 = vmul.f32 %v135_v19, %v674_v4  ;;  %v286_v35 = vmul.f32 %v285_v27, %v685_v9 }
  0x4e   :  { %v687_v10 = vadd.f32 -1.0, %v97_v7  ;;  %v692_v11 = vsel %vm94_vm0, %v672_v3, %v401_v6  ;;  %v263_v21 = vadd.f32 21.0, %v705_v17  ;;  %v125_v38 = vmul.f32 %v124_v30, %v674_v4  ;;  %p559_p7 = por %p558_p6, %p557_p5 }
  0x4f   :  { %v113_v14 = vadd.f32 21.0, %v692_v11  ;;  %v296_v22 = vadd.f32 33.458332, %v700_v16  ;;  %v137_v31 = vadd.f32 175.0, %v136_v24  ;;  %v102_v32 = vadd.f32 33.458332, %v692_v11 }
  0x50   :  { %v146_v15 = vadd.f32 33.458332, %v687_v10  ;;  %v264_v26 = vmul.f32 %v263_v21, %v705_v17  ;;  %v287_v43 = vadd.f32 175.0, %v286_v35  ;;  %v157_v44 = vadd.f32 21.0, %v687_v10  ;;  %p560_p8 = pnand %p559_p7, %p553_p4 }
  0x51   :  { %v114_v18 = vmul.f32 %v113_v14, %v692_v11  ;;  %v297_v28 = vmul.f32 %v700_v16, %v296_v22  ;;  %v138_v39 = vmul.f32 %v137_v31, %v674_v4  ;;  %v103_v40 = vmul.f32 %v102_v32, %v692_v11 }
  0x52   :  { %v147_v20 = vmul.f32 %v687_v10, %v146_v15  ;;  %v265_v34 = vadd.f32 175.0, %v264_v26  ;;  %v252_v46 = vadd.f32 33.458332, %v705_v17  ;;  %v126_v49 = vadd.f32 466.3342, %v125_v38 }
  0x53   :  { %v115_v23 = vadd.f32 175.0, %v114_v18  ;;  %v298_v36 = vadd.f32 466.3342, %v297_v28  ;;  %v139_v50 = vadd.f32 735.0, %v138_v39  ;;  %v104_v51 = vadd.f32 466.3342, %v103_v40 }
  0x54   :  { %v148_v25 = vadd.f32 466.3342, %v147_v20  ;;  %v266_v42 = vmul.f32 %v265_v34, %v705_v17  ;;  %v288_v54 = vmul.f32 %v287_v43, %v685_v9  ;;  %v158_v55 = vmul.f32 %v687_v10, %v157_v44 }
  0x55   :  { %v116_v29 = vmul.f32 %v115_v23, %v692_v11  ;;  %v299_v45 = vmul.f32 %v700_v16, %v298_v36  ;;  %v253_v57 = vmul.f32 %v252_v46, %v705_v17  ;;  %v275_v58 = vmul.f32 %v274_v47, %v685_v9 }
  0x56   :  { %v149_v33 = vmul.f32 %v687_v10, %v148_v25  ;;  %v267_v53 = vadd.f32 735.0, %v266_v42  ;;  %v307_v59 = vadd.f32 21.0, %v700_v16  ;;  %v127_v61 = vmul.f32 %v126_v49, %v674_v4 }
  0x57   :  { %v117_v37 = vadd.f32 735.0, %v116_v29  ;;  %v300_v56 = vadd.f32 3465.7095, %v299_v45  ;;  %v140_v62 = vmul.f32 %v139_v50, %v674_v4  ;;  %v105_v63 = vmul.f32 %v104_v51, %v692_v11 }
  0x58   :  { %v150_v41 = vadd.f32 3465.7095, %v149_v33  ;;  %v268_v1 = vmul.f32 %v267_v53, %v705_v17  ;;  %v289_v6 = vadd.f32 735.0, %v288_v54  ;;  %v159_v7 = vadd.f32 175.0, %v158_v55 }
  0x59   :  { %v118_v48 = vmul.f32 %v117_v37, %v692_v11  ;;  %v301_v12 = vmul.f32 %v700_v16, %v300_v56  ;;  %v254_v13 = vadd.f32 466.3342, %v253_v57  ;;  %v276_v14 = vadd.f32 466.3342, %v275_v58 }
  0x5a   :  { %v151_v52 = vmul.f32 %v687_v10, %v150_v41  ;;  %v308_v15 = vmul.f32 %v700_v16, %v307_v59  ;;  %v128_v19 = vadd.f32 3465.7095, %v127_v61  ;;  %v141_v20 = vadd.f32 1624.0, %v140_v62 }
  0x5b   :  { %v119_v60 = vadd.f32 1624.0, %v118_v48  ;;  %v106_v21 = vadd.f32 3465.7095, %v105_v63  ;;  %v269_v23 = vadd.f32 1624.0, %v268_v1  ;;  %v290_v24 = vmul.f32 %v289_v6, %v685_v9 }
  0x5c   :  { %v152_v0 = vadd.f32 14484.914, %v151_v52  ;;  %v160_v25 = vmul.f32 %v687_v10, %v159_v7  ;;  %v302_v26 = vadd.f32 14484.914, %v301_v12  ;;  %v255_v27 = vmul.f32 %v254_v13, %v705_v17  ;;  %v80_v13 = vld [vmem:[#allocation6] sm:$0xff] }
  0x5d   :  { %v120_v18 = vmul.f32 %v119_v60, %v692_v11  ;;  %v277_v28 = vmul.f32 %v276_v14, %v685_v9  ;;  %v309_v29 = vadd.f32 175.0, %v308_v15  ;;  %v129_v31 = vmul.f32 %v128_v19, %v674_v4  ;;  %v230_v14 = vld [vmem:[#allocation6 + $0x8] sm:$0xff] }
  0x5e   :  { %v153_v22 = vmul.f32 %v687_v10, %v152_v0  ;;  %v142_v32 = vmul.f32 %v141_v20, %v674_v4  ;;  %v107_v33 = vmul.f32 %v106_v21, %v692_v11  ;;  %v270_v35 = vmul.f32 %v269_v23, %v705_v17 }
  0x5f   :  { %v121_v30 = vadd.f32 1764.0, %v120_v18  ;;  %v291_v36 = vadd.f32 1624.0, %v290_v24  ;;  %v161_v37 = vadd.f32 735.0, %v160_v25  ;;  %v303_v38 = vmul.f32 %v700_v16, %v302_v26 }
  0x60   :  { %v154_v34 = vadd.f32 32281.064, %v153_v22  ;;  %v256_v39 = vadd.f32 3465.7095, %v255_v27  ;;  %v278_v40 = vadd.f32 3465.7095, %v277_v28  ;;  %v310_v41 = vmul.f32 %v700_v16, %v309_v29 }
  0x61   :  { %v122_v42 = vmul.f32 %v121_v30, %v692_v11  ;;  %v130_v43 = vadd.f32 14484.914, %v129_v31  ;;  %v143_v44 = vadd.f32 1764.0, %v142_v32  ;;  %v108_v45 = vadd.f32 14484.914, %v107_v33 }
  0x62   :  { %v155_v46 = vmul.f32 %v687_v10, %v154_v34  ;;  %v271_v47 = vadd.f32 1764.0, %v270_v35  ;;  %v292_v48 = vmul.f32 %v291_v36, %v685_v9  ;;  %v162_v49 = vmul.f32 %v687_v10, %v161_v37 }
  0x63   :  { %v304_v50 = vadd.f32 32281.064, %v303_v38  ;;  %v257_v51 = vmul.f32 %v256_v39, %v705_v17  ;;  %v279_v52 = vmul.f32 %v278_v40, %v685_v9  ;;  %v311_v53 = vadd.f32 735.0, %v310_v41 }
  0x64   :  { %v123_v54 = vadd.f32 720.0, %v122_v42  ;;  %v131_v55 = vmul.f32 %v130_v43, %v674_v4  ;;  %v144_v56 = vmul.f32 %v143_v44, %v674_v4  ;;  %v109_v57 = vmul.f32 %v108_v45, %v692_v11 }
  0x65   :  { %v156_v58 = vadd.f32 29969.594, %v155_v46  ;;  %v272_v59 = vmul.f32 %v271_v47, %v705_v17  ;;  %v293_v60 = vadd.f32 1764.0, %v292_v48  ;;  %v765_v61 = vadd.f32 5.5, %v692_v11 }
  0x66   :  { %v163_v62 = vadd.f32 1624.0, %v162_v49  ;;  %v305_v63 = vmul.f32 %v700_v16, %v304_v50  ;;  %412 = vlog2.f32 %v672_v3  ;;  %v258_v0 = vadd.f32 14484.914, %v257_v51 }
  0x67   :  { %v280_v1 = vadd.f32 14484.914, %v279_v52  ;;  %v312_v6 = vmul.f32 %v700_v16, %v311_v53  ;;  %v132_v7 = vadd.f32 32281.064, %v131_v55  ;;  %v145_v12 = vadd.f32 720.0, %v144_v56 }
  0x68   :  { %414 = vrcp.f32 %v123_v54  ;;  %v110_v15 = vadd.f32 32281.064, %v109_v57  ;;  %v273_v18 = vadd.f32 720.0, %v272_v59  ;;  %v294_v19 = vmul.f32 %v293_v60, %v685_v9 }
  0x69   :  { %416 = vrcp.f32 %v156_v58  ;;  %v164_v20 = vmul.f32 %v687_v10, %v163_v62  ;;  %v306_v21 = vadd.f32 29969.594, %v305_v63  ;;  %v774_v23 = vadd.f32 5.5, %v705_v17 }
  0x6a   :  { %418 = vlog2.f32 %v765_v61  ;;  %v259_v24 = vmul.f32 %v258_v0, %v705_v17  ;;  %v281_v25 = vmul.f32 %v280_v1, %v685_v9  ;;  %v313_v26 = vadd.f32 1624.0, %v312_v6 }
  0x6b   :  { %420 = vrcp.f32 %v145_v12  ;;  %v111_v29 = vmul.f32 %v110_v15, %v692_v11  ;;  %v133_v30 = vmul.f32 %v132_v7, %v674_v4  ;;  %v295_v31 = vadd.f32 720.0, %v294_v19 }
  0x6c   :  { %422 = vrcp.f32 %v273_v18  ;;  %v165_v34 = vadd.f32 1764.0, %v164_v20  ;;  %v260_v35 = vadd.f32 32281.064, %v259_v24  ;;  %v282_v36 = vadd.f32 32281.064, %v281_v25 }
  0x6d   :  { %424 = vrcp.f32 %v306_v21  ;;  %v314_v37 = vmul.f32 %v700_v16, %v313_v26  ;;  %v792_v40 = vadd.f32 5.5, %v674_v4  ;;  %v795_v42 = vadd.f32 5.5, %v685_v9 }
  0x6e   :  { %426 = vlog2.f32 %v774_v23  ;;  %v112_v44 = vadd.f32 29969.594, %v111_v29  ;;  %v134_v45 = vadd.f32 29969.594, %v133_v30  ;;  %v166_v46 = vmul.f32 %v687_v10, %v165_v34 }
  0x6f   :  { %428 = vlog2.f32 %v682_v8  ;;  %v261_v48 = vmul.f32 %v260_v35, %v705_v17  ;;  %v283_v49 = vmul.f32 %v282_v36, %v685_v9  ;;  %v315_v50 = vadd.f32 1764.0, %v314_v37 }
  0x70   :  { %v413_v41 = vpop.eup %412  ;;  %430 = vrcp.f32 %v295_v31  ;;  %v802_v52 = vadd.f32 5.5, %v687_v10  ;;  %v167_v54 = vadd.f32 720.0, %v166_v46  ;;  %v805_v57 = vadd.f32 5.5, %v700_v16 }
  0x71   :  { %v262_v59 = vadd.f32 29969.594, %v261_v48  ;;  %v284_v60 = vadd.f32 29969.594, %v283_v49  ;;  %v316_v62 = vmul.f32 %v700_v16, %v315_v50  ;;  %v176_v12 = vadd.f32 0.5, %v692_v11 }
  0x72   :  { %v415_v43 = vpop.eup %414  ;;  %v326_v21 = vadd.f32 0.5, %v705_v17  ;;  %v813_v25 = vmul.f32 0.6931472, %v413_v41  ;;  %vm221_vm2 = vcmp.le.f32.partialorder %v674_v4, 1e-08 }
  0x73   :  { %v417_v47 = vpop.eup %416  ;;  %v169_v55 = vmul.f32 %v415_v43, %v112_v44  ;;  %v317_v15 = vadd.f32 720.0, %v316_v62  ;;  %v182_v43 = vadd.f32 0.5, %v674_v4  ;;  %vm371_vm3 = vcmp.le.f32.partialorder %v685_v9, 1e-08 }
  0x74   :  { %v419_v51 = vpop.eup %418  ;;  %v171_v56 = vmul.f32 %v417_v47, %v134_v45 }
  0x75   :  { %v421_v53 = vpop.eup %420 }
  0x76   :  { %v423_v58 = vpop.eup %422  ;;  %v172_v6 = vmul.f32 %v171_v56, %v169_v55  ;;  %v174_v7 = vmul.f32 %v421_v53, %v167_v54  ;;  %v188_v56 = vadd.f32 0.5, %v687_v10 }
  0x77   :  { %v425_v63 = vpop.eup %424  ;;  %v319_v18 = vmul.f32 %v423_v58, %v262_v59  ;;  %v83_v59 = vld [vmem:[#allocation9] sm:$0xff] }
  0x78   :  { %v427_v0 = vpop.eup %426  ;;  %v321_v19 = vmul.f32 %v425_v63, %v284_v60  ;;  %v175_v31 = vmul.f32 %v174_v7, %v172_v6  ;;  %v233_v60 = vld [vmem:[#allocation9 + $0x8] sm:$0xff] }
  0x79   :  { %v429_v1 = vpop.eup %428  ;;  %v373_v3 = vmul.f32 %v233_v60, %v233_v60 }
  0x7a   :  { %v817_v30 = vmul.f32 0.6931472, %v429_v1  ;;  %v322_v35 = vmul.f32 %v321_v19, %v319_v18 }
  0xc9   :  { %v77_v22 = vpop.permute.xlu0 %76 }
  0xca   :  { %v778_v27 = vmul.f32 %v80_v13, %v77_v22  ;;  %v780_v28 = vmul.f32 %v230_v14, %v77_v22  ;;  %v178_v13 = vmul.f32 0.6931472, %v419_v51  ;;  %v431_v14 = vpop.eup %430  ;;  %v328_v22 = vmul.f32 0.6931472, %v427_v0 }
  0xcb   :  { %v324_v17 = vmul.f32 %v431_v14, %v317_v15  ;;  %v338_v0 = vadd.f32 0.5, %v700_v16 }
  0xcc   :  { %v87_v32 = vadd.f32 %v669_v2, %v778_v27  ;;  %v237_v33 = vadd.f32 %v676_v5, %v780_v28  ;;  %v241_v36 = vadd.f32 1e-10, %v780_v28  ;;  %v332_v28 = vadd.f32 0.5, %v685_v9 }
  0xcd   :  { %v325_v48 = vmul.f32 %v324_v17, %v322_v35 }
  0xce   :  { %v88_v38 = vadd.f32 1e-10, %v87_v32  ;;  %v238_v39 = vadd.f32 1e-10, %v237_v33  ;;  %v179_v32 = vmul.f32 %v178_v13, %v176_v12  ;;  %v91_v33 = vadd.f32 1e-10, %v778_v27 }
  0xcf   :  { %v206_v12 = vsub.f32 1.0, %v83_v59  ;;  %v356_v13 = vsub.f32 1.0, %v233_v60 }
  0xd0   :  { %432 = vlog2.f32 %v88_v38  ;;  %v329_v38 = vmul.f32 %v328_v22, %v326_v21  ;;  %v180_v27 = vadd.f32 0.9189385, %v179_v32 }
  0xd1   :  { %434 = vlog2.f32 %v238_v39  ;;  %v207_v21 = vadd.f32 1e-10, %v206_v12 }
  0xd2   :  { %436 = vlog2.f32 %v792_v40  ;;  %v330_v50 = vadd.f32 0.9189385, %v329_v38  ;;  %v181_v55 = vsub.f32 %v180_v27, %v765_v61 }
  0xd3   :  { %438 = vlog2.f32 %v795_v42 }
  0xd4   :  { %440 = vlog2.f32 %v802_v52  ;;  %v331_v62 = vsub.f32 %v330_v50, %v774_v23  ;;  %v357_v23 = vadd.f32 1e-10, %v356_v13 }
  0xd5   :  { %442 = vlog2.f32 %v805_v57 }
  0xd6   :  { %444 = vlog2.f32 %v175_v31 }
  0xd7   :  { %446 = vlog2.f32 %v91_v33  ;;  %v199_v33 = vadd.f32 %v669_v2, %v674_v4 }
  0xd8   :  { %448 = vlog2.f32 %v241_v36 }
  0xda   :  { %v433_v20 = vpop.eup %432 }
  0xdb   :  { %v435_v24 = vpop.eup %434  ;;  %v815_v26 = vmul.f32 0.6931472, %v433_v20 }
  0xdc   :  { %v437_v29 = vpop.eup %436  ;;  %v819_v11 = vmul.f32 0.6931472, %v435_v24 }
  0xdd   :  { %v211_v34 = vsub.f32 %v813_v25, %v815_v26  ;;  %v439_v39 = vpop.eup %438  ;;  %v184_v44 = vmul.f32 0.6931472, %v437_v29 }
  0xde   :  { %v361_v37 = vsub.f32 %v817_v30, %v819_v11  ;;  %v441_v46 = vpop.eup %440  ;;  %v334_v51 = vmul.f32 0.6931472, %v439_v39 }
  0xdf   :  { %v212_v41 = vmul.f32 %v211_v34, %v669_v2  ;;  %v443_v53 = vpop.eup %442  ;;  %v185_v54 = vmul.f32 %v184_v44, %v182_v43  ;;  %v190_v58 = vmul.f32 0.6931472, %v441_v46  ;;  %v349_v34 = vadd.f32 %v676_v5, %v685_v9 }
  0xe0   :  { %v362_v45 = vmul.f32 %v361_v37, %v676_v5  ;;  %v335_v63 = vmul.f32 %v334_v51, %v332_v28  ;;  %v340_v1 = vmul.f32 0.6931472, %v443_v53  ;;  %v445_v14 = vpop.eup %444  ;;  %v200_v37 = vsub.f32 %v815_v26, %v813_v25 }
  0xe1   :  { %v213_v47 = vmul.f32 1.442695, %v212_v41  ;;  %v186_v6 = vadd.f32 %v185_v54, %v181_v55  ;;  %v191_v7 = vmul.f32 %v190_v58, %v188_v56  ;;  %v447_v61 = vpop.eup %446  ;;  %v195_v38 = vmul.f32 0.6931472, %v445_v14 }
  0xe2   :  { %v363_v49 = vmul.f32 1.442695, %v362_v45  ;;  %v336_v15 = vadd.f32 %v335_v63, %v331_v62  ;;  %v341_v18 = vmul.f32 %v340_v1, %v338_v0  ;;  %v449_v19 = vpop.eup %448  ;;  %v93_v35 = vmul.f32 0.6931472, %v447_v61 }
  0xe3   :  { %450 = vpow2.f32 %v213_v47  ;;  %v187_v10 = vsub.f32 %v186_v6, %v792_v40  ;;  %v192_v20 = vsub.f32 %v191_v7, %v802_v52  ;;  %v243_v17 = vmul.f32 0.6931472, %v449_v19 }
  0xe4   :  { %452 = vpow2.f32 %v363_v49  ;;  %v337_v16 = vsub.f32 %v336_v15, %v795_v42  ;;  %v342_v31 = vsub.f32 %v341_v18, %v805_v57  ;;  %v350_v57 = vsub.f32 %v819_v11, %v817_v30 }
  0xe5   :  { %454 = vlog2.f32 %v325_v48  ;;  %v193_v52 = vsub.f32 %v187_v10, %v192_v20  ;;  %v202_v5 = vsub.f32 %v813_v25, %v93_v35  ;;  %v352_v44 = vsub.f32 %v817_v30, %v243_v17 }
  0xe6   :  { %456 = vlog2.f32 %v207_v21  ;;  %v343_v2 = vsub.f32 %v337_v16, %v342_v31  ;;  %v201_v45 = vmul.f32 %v200_v37, %v199_v33  ;;  %v351_v46 = vmul.f32 %v350_v57, %v349_v34 }
  0xe7   :  { %458 = vlog2.f32 %v357_v23  ;;  %v196_v27 = vadd.f32 %v195_v38, %v193_v52  ;;  %v197_v26 = vsel %vm94_vm0, %v813_v25, 0.0  ;;  %v203_v11 = vmul.f32 %v202_v5, %v674_v4 }
  0xe8   :  { %v347_v48 = vsel %vm244_vm1, %v817_v30, 0.0  ;;  %v353_v28 = vmul.f32 %v352_v44, %v685_v9  ;;  %v223_v56 = vmul.f32 %v83_v59, %v83_v59 }
  0xe9   :  { %v204_v49 = vadd.f32 %v203_v11, %v201_v45  ;;  %v198_v50 = vsub.f32 %v196_v27, %v197_v26 }
  0xea   :  { %v354_v53 = vadd.f32 %v353_v28, %v351_v46  ;;  %v224_v8 = vmul.f32 0.1, %v223_v56 }
  0xeb   :  { %v205_v58 = vadd.f32 %v204_v49, %v198_v50 }
  0xed   :  { %v451_v22 = vpop.eup %450 }
  0xee   :  { %v453_v24 = vpop.eup %452  ;;  %v215_v29 = vmul.f32 %v451_v22, %v206_v12 }
  0xef   :  { %v455_v32 = vpop.eup %454  ;;  %v365_v40 = vmul.f32 %v453_v24, %v356_v13  ;;  %v374_v13 = vmul.f32 0.1, %v373_v3 }
  0xf0   :  { %v216_v36 = vadd.f32 %v215_v29, %v83_v59  ;;  %v345_v41 = vmul.f32 0.6931472, %v455_v32  ;;  %v457_v51 = vpop.eup %456 }
  0xf1   :  { %v366_v42 = vadd.f32 %v365_v40, %v233_v60  ;;  %v459_v55 = vpop.eup %458  ;;  %v209_v62 = vmul.f32 0.6931472, %v457_v51 }
  0xf2   :  { %v217_v39 = vadd.f32 1e-10, %v216_v36  ;;  %v346_v47 = vadd.f32 %v345_v41, %v343_v2  ;;  %v359_v0 = vmul.f32 0.6931472, %v459_v55 }
  0xf3   :  { %v367_v43 = vadd.f32 1e-10, %v366_v42  ;;  %v210_v7 = vsub.f32 %v205_v58, %v209_v62 }
  0xf4   :  { %460 = vlog2.f32 %v217_v39  ;;  %v348_v54 = vsub.f32 %v346_v47, %v347_v48 }
  0xf5   :  { %462 = vlog2.f32 %v367_v43 }
  0xf6   :  { %v355_v63 = vadd.f32 %v354_v53, %v348_v54 }
  0xf8   :  { %v360_v14 = vsub.f32 %v355_v63, %v359_v0 }
  0xfe   :  { %v461_v25 = vpop.eup %460 }
  0xff   :  { %v463_v1 = vpop.eup %462  ;;  %v219_v6 = vmul.f32 0.6931472, %v461_v25 }
 0x100   :  { %v369_v30 = vmul.f32 0.6931472, %v463_v1 }
 0x101   :  { %v220_v12 = vsub.f32 0.0, %v219_v6 }
 0x102   :  { %v370_v15 = vsub.f32 0.0, %v369_v30 }
 0x103   :  { %v222_v59 = vsel %vm221_vm2, %v220_v12, %v210_v7 }
 0x104   :  { %v225_v18 = vadd.f32 %v224_v8, %v222_v59  ;;  %v372_v61 = vsel %vm371_vm3, %v370_v15, %v360_v14 }
 0x105   :  { %v375_v60 = vadd.f32 %v374_v13, %v372_v61 }
 0x107   :  { %v377_v19 = vadd.f32 %v375_v60, %v225_v18 }
 0x109   :  { %383 = vst [vmem:[#allocation11] sm:$0xff] %v377_v19 }
 0x10a   :  { %563 = shalt.err (!%p560_p8)
}
 0x10b   :  { %s564_s17 = scalar_lea.hbm %s876_s5, 128 }
 0x10c   :  { %p565_p9 = scmp.ne.s32.totalorder %s876_s5, %s564_s17  ;;  %p568_p10 = scmp.lt.u32.totalorder %s564_s17, %s876_s5 }
 0x10e   :  { %p570_p11 = pnand %p568_p10, %p565_p9 }
 0x110   :  { %573 = shalt.err (!%p570_p11)
}
 0x111   :  { %393 = dma.vmem_to_hbm [thread:$0]  %s391_s4, 128, %s876_s5, [#allocation5]  }
 0x112   :  { %580 = dma.done.wait [#allocation5], 128  }
 0x113   :  { %581 = vsyncadd [#allocation5], 4294967168 }
 0x114   :  { %397 = vsyncpa [#allocation4], 1 }
 0x115   :  { %398 = vsyncpa [#allocation7], 1 }
 0x116   :  { %399 = vsyncpa [#allocation10], 1 }
 0x117   :  { %400 = vsyncpa [#allocation5], 1 }

</bundles_post_ra>
